<compile_context>
chip_gen: v7x
topology: tpu7x:2x2x1
jax: 0.10.0
libtpu: 0.0.40
codegen_flags: <defaults>
</compile_context>

<pallas_src>
import functools

import jax
import jax.numpy as jnp
from jax.experimental import pallas as pl
from jax.experimental.pallas import tpu as pltpu


def _layer_norm_kernel(x_ref, g_ref, b_ref, o_ref, *, eps, inv_c):
    # x_ref: (1, C, tT) block  -- C on sublanes, T on lanes.
    # g_ref/b_ref: (1, C, 1)   -- per-channel scale/shift, broadcast along T.
    x = x_ref[...].astype(jnp.float32)

    # Fused single pass over the block: sum(x) and sum(x*x) along the channel axis.
    s = jnp.sum(x, axis=1, keepdims=True)           # (1, 1, tT)
    ss = jnp.sum(x * x, axis=1, keepdims=True)      # (1, 1, tT)
    mean = s * inv_c
    var = jnp.maximum(ss * inv_c - mean * mean, 0.0)
    inv = jax.lax.rsqrt(var + eps)

    g = g_ref[...].astype(jnp.float32)              # (1, C, 1) -> broadcast over T
    b = b_ref[...].astype(jnp.float32)
    y = (x - mean) * inv * g + b
    o_ref[...] = y.astype(o_ref.dtype)


def _choose_tile_t(T, C, itemsize):
    """Pick a lane-dense T tile (~<=2 MiB per block) that keeps VMEM use tiny on v5e/v6e/v7x."""
    if T <= 128:
        return T  # full extent: always a legal block shape
    max_t = (2 * 1024 * 1024) // max(1, C * itemsize)   # ~2 MiB block target
    max_t = max(128, (max_t // 128) * 128)               # multiple of 128 lanes
    t_pad = ((T + 127) // 128) * 128
    return min(max_t, t_pad)


def layer_norm(x, gamma, beta, eps=1e-4, *, tile_t=None):
    """Pallas equivalent of the TTS LayerNorm.forward (normalizes over dim 1 of (B, C, T))."""
    B, C, T = x.shape
    g = jnp.reshape(gamma, (1, C, 1))
    b = jnp.reshape(beta, (1, C, 1))

    if tile_t is None:
        tile_t = _choose_tile_t(T, C, jnp.dtype(x.dtype).itemsize)
    grid = (B, pl.cdiv(T, tile_t))

    kernel = functools.partial(_layer_norm_kernel, eps=float(eps), inv_c=1.0 / C)

    return pl.pallas_call(
        kernel,
        out_shape=jax.ShapeDtypeStruct((B, C, T), x.dtype),
        grid=grid,
        in_specs=[
            pl.BlockSpec((1, C, tile_t), lambda ib, it: (ib, 0, it)),
            pl.BlockSpec((1, C, 1), lambda ib, it: (0, 0, 0)),
            pl.BlockSpec((1, C, 1), lambda ib, it: (0, 0, 0)),
        ],
        out_specs=pl.BlockSpec((1, C, tile_t), lambda ib, it: (ib, 0, it)),
        compiler_params=pltpu.CompilerParams(
            dimension_semantics=("parallel", "parallel")),
    )(x, g, b)


def _reference(x, gamma, beta, eps=1e-4):
    # Pure-JAX transcription of the PyTorch module's forward.
    xf = x.astype(jnp.float32)
    mean = jnp.mean(xf, axis=1, keepdims=True)
    var = jnp.mean(jnp.square(xf - mean), axis=1, keepdims=True)
    y = (xf - mean) * jax.lax.rsqrt(var + eps)
    y = y * jnp.reshape(gamma, (1, -1, 1)).astype(jnp.float32) \
        + jnp.reshape(beta, (1, -1, 1)).astype(jnp.float32)
    return y.astype(x.dtype)


if __name__ == "__main__":
    key = jax.random.PRNGKey(0)
    B, C, T = 2, 4, 16                              # input: (B, C, T)
    eps = 1e-4                                      # module default

    x = jax.random.normal(key, (B, C, T), dtype=jnp.float32)
    # Matches nn.Parameter(torch.ones(1, C, 1) * 0.1) / torch.zeros(1, C, 1)
    gamma = jnp.ones((1, C, 1), dtype=jnp.float32) * 0.1
    beta = jnp.zeros((1, C, 1), dtype=jnp.float32)

    out = layer_norm(x, gamma, beta, eps=eps)
    out = jax.block_until_ready(out)

    ref = _reference(x, gamma, beta, eps=eps)
    assert out.shape == (B, C, T)
    assert out.dtype == x.dtype
    assert jnp.allclose(out, ref, atol=1e-5, rtol=1e-5)

    print("KERNEL_OK")
</pallas_src>

<mosaic_0001>
module attributes {stable_mosaic.version = 11 : i64} {
  func.func @_layer_norm_kernel(%arg0: i32, %arg1: i32, %arg2: memref<1x4x16xf32, #tpu.memory_space<vmem>>, %arg3: memref<1x4x1xf32, #tpu.memory_space<vmem>>, %arg4: memref<1x4x1xf32, #tpu.memory_space<vmem>>, %arg5: memref<1x4x16xf32, #tpu.memory_space<vmem>>) attributes {dimension_semantics = [#tpu.dimension_semantics<parallel>, #tpu.dimension_semantics<parallel>], iteration_bounds = array<i64: 2, 1>, scalar_prefetch = 0 : i64, scratch_operands = 0 : i64, tpu.core_type = #tpu.core_type<tc>, window_params = [{transform_indices = @transform_0, window_bounds = array<i64: 1, 4, 16>}, {pipeline_mode = #tpu.pipeline_mode<synchronous>, transform_indices = @transform_1, window_bounds = array<i64: 1, 4, 1>}, {pipeline_mode = #tpu.pipeline_mode<synchronous>, transform_indices = @transform_2, window_bounds = array<i64: 1, 4, 1>}, {transform_indices = @transform_3, window_bounds = array<i64: 1, 4, 16>}]} {
    %c0 = arith.constant 0 : index
    %c0_0 = arith.constant 0 : index
    %c0_1 = arith.constant 0 : index
    %0 = vector.load %arg2[%c0, %c0_0, %c0_1] : memref<1x4x16xf32, #tpu.memory_space<vmem>>, vector<1x4x16xf32>
    %cst = arith.constant dense<0.000000e+00> : vector<1x16xf32>
    %1 = vector.multi_reduction <add>, %0, %cst [1] : vector<1x4x16xf32> to vector<1x16xf32>
    %2 = vector.shape_cast %1 : vector<1x16xf32> to vector<1x1x16xf32>
    %3 = arith.mulf %0, %0 : vector<1x4x16xf32>
    %cst_2 = arith.constant dense<0.000000e+00> : vector<1x16xf32>
    %4 = vector.multi_reduction <add>, %3, %cst_2 [1] : vector<1x4x16xf32> to vector<1x16xf32>
    %5 = vector.shape_cast %4 : vector<1x16xf32> to vector<1x1x16xf32>
    %cst_3 = arith.constant 2.500000e-01 : f32
    %6 = vector.broadcast %cst_3 : f32 to vector<1x1x16xf32>
    %7 = arith.mulf %2, %6 : vector<1x1x16xf32>
    %cst_4 = arith.constant 2.500000e-01 : f32
    %8 = vector.broadcast %cst_4 : f32 to vector<1x1x16xf32>
    %9 = arith.mulf %5, %8 : vector<1x1x16xf32>
    %10 = arith.mulf %7, %7 : vector<1x1x16xf32>
    %11 = arith.subf %9, %10 : vector<1x1x16xf32>
    %cst_5 = arith.constant 0.000000e+00 : f32
    %12 = vector.broadcast %cst_5 : f32 to vector<1x1x16xf32>
    %13 = arith.maximumf %11, %12 : vector<1x1x16xf32>
    %cst_6 = arith.constant 9.99999974E-5 : f32
    %14 = vector.broadcast %cst_6 : f32 to vector<1x1x16xf32>
    %15 = arith.addf %13, %14 : vector<1x1x16xf32>
    %16 = math.rsqrt %15 : vector<1x1x16xf32>
    %c0_7 = arith.constant 0 : index
    %c0_8 = arith.constant 0 : index
    %c0_9 = arith.constant 0 : index
    %17 = vector.load %arg3[%c0_7, %c0_8, %c0_9] : memref<1x4x1xf32, #tpu.memory_space<vmem>>, vector<1x4x1xf32>
    %c0_10 = arith.constant 0 : index
    %c0_11 = arith.constant 0 : index
    %c0_12 = arith.constant 0 : index
    %18 = vector.load %arg4[%c0_10, %c0_11, %c0_12] : memref<1x4x1xf32, #tpu.memory_space<vmem>>, vector<1x4x1xf32>
    %19 = vector.broadcast %7 : vector<1x1x16xf32> to vector<1x4x16xf32>
    %20 = arith.subf %0, %19 : vector<1x4x16xf32>
    %21 = vector.broadcast %16 : vector<1x1x16xf32> to vector<1x4x16xf32>
    %22 = arith.mulf %20, %21 : vector<1x4x16xf32>
    %23 = vector.broadcast %17 : vector<1x4x1xf32> to vector<1x4x16xf32>
    %24 = arith.mulf %22, %23 : vector<1x4x16xf32>
    %25 = vector.broadcast %18 : vector<1x4x1xf32> to vector<1x4x16xf32>
    %26 = arith.addf %24, %25 : vector<1x4x16xf32>
    %c0_13 = arith.constant 0 : index
    %c0_14 = arith.constant 0 : index
    %c0_15 = arith.constant 0 : index
    %27 = vector.load %arg5[%c0_13, %c0_14, %c0_15] : memref<1x4x16xf32, #tpu.memory_space<vmem>>, vector<1x4x16xf32>
    tpu.vector_store %arg5[%c0_13, %c0_14, %c0_15], %26 {strides = array<i32>} : memref<1x4x16xf32, #tpu.memory_space<vmem>>, vector<1x4x16xf32>,
    return
  }
  func.func @transform_0(%arg0: i32, %arg1: i32) -> (i32, i32, i32) {
    %c0_i32 = arith.constant 0 : i32
    %c0_i32_0 = arith.constant 0 : i32
    return %arg0, %c0_i32, %arg1 : i32, i32, i32
  }
  func.func @transform_1(%arg0: i32, %arg1: i32) -> (i32, i32, i32) {
    %c0_i32 = arith.constant 0 : i32
    %c0_i32_0 = arith.constant 0 : i32
    %c0_i32_1 = arith.constant 0 : i32
    %c0_i32_2 = arith.constant 0 : i32
    return %c0_i32, %c0_i32_0, %c0_i32_1 : i32, i32, i32
  }
  func.func @transform_2(%arg0: i32, %arg1: i32) -> (i32, i32, i32) {
    %c0_i32 = arith.constant 0 : i32
    %c0_i32_0 = arith.constant 0 : i32
    %c0_i32_1 = arith.constant 0 : i32
    %c0_i32_2 = arith.constant 0 : i32
    return %c0_i32, %c0_i32_0, %c0_i32_1 : i32, i32, i32
  }
  func.func @transform_3(%arg0: i32, %arg1: i32) -> (i32, i32, i32) {
    %c0_i32 = arith.constant 0 : i32
    %c0_i32_0 = arith.constant 0 : i32
    return %arg0, %c0_i32, %arg1 : i32, i32, i32
  }
}

</mosaic_0001>

<bundles_post_ra>
// kernel: tpu_custom_call.1
= control target key start
LH: loop header
LB: loop body
LE: loop exit
PB: predicated region body
PF: predicated region fallthrough
CT: control target
= control target key end

     0   :  { %8 = vsyncpa [#allocation3], 0  ;;  %s611_s0 = inlined_call_operand.vmem [shape: f32[2,4,16], index: 0, kind: input, shape index: {}]   ;;  %s612_s1 = inlined_call_operand.vmem [shape: f32[1,4,1], index: 1, kind: input, shape index: {}]   ;;  %s613_s2 = inlined_call_operand.vmem [shape: f32[1,4,1], index: 2, kind: input, shape index: {}]   ;;  %s614_s3 = inlined_call_operand.hbm [shape: f32[2,4,16], index: 3, kind: output, shape index: {}]  }
   0x1   :  { %10 = vsyncpa [#allocation3 + $0x1], 0  ;;  %s490_s12 = smov 0   ;;  %s492_s13 = smov 0  }
   0x2   :  { %s494_s14 = smov 0   ;;  %s496_s15 = smov 0  }
   0x3   :  { %s498_s16 = smov 0   ;;  %s500_s17 = smov 0  }
   0x4 LB: > { %s318_s18 = sadd.s32 4294967295, %s466_s17   ;;  %s319_s19 = sadd.s32 4294967294, %s466_s17   ;;  %s466_s17 = sphi %s500_s17, %s16_s17   ;;  %s462_s16 = sphi %s498_s16, %s621_s16   ;;  %s458_s15 = sphi %s496_s15, %s620_s15   ;;  %s454_s14 = sphi %s494_s14, %s619_s14   ;;  %s450_s13 = sphi %s492_s13, %s618_s13   ;;  %s446_s12 = sphi %s490_s12, %s617_s12  }
   0x5   : > { %s28_s20 = sadd.s32 1, %s462_s16  ;;  %s107_s21 = sadd.s32 1, %s454_s14 }
   0x6   : > { %p30_p0 = scmp.ge.s32.totalorder %s28_s20, 2  ;;  %p117_p1 = scmp.ne.s32.totalorder %s454_s14, %s450_s13 }
   0x7   : > { %p118_p2 = scmp.eq.s32.totalorder %s318_s18, 1  ;;  %p123_p3 = scmp.ne.s32.totalorder %s450_s13, %s446_s12 }
   0x8   : > { %s623_s20 = smov (%p30_p0, %s28_s20), 0  ;;  %p124_p5 = scmp.eq.s32.totalorder %s319_s19, 1 }
   0x9   : > { %p530_p4 = por %p118_p2, %p117_p1  ;;  %s102_s23 = ssub.s32 %s462_s16, %s623_s20 }
   0xa   : > { %p322_p6 = scmp.ge.s32.totalorder %s466_s17, 1  ;;  %p105_p7 = scmp.eq.s32.totalorder %s102_s23, 0 }
   0xb   : > { %p537_p8 = por %p124_p5, %p123_p3  ;;  %p158_p9 = scmp.lt.s32.totalorder %s466_s17, 3 }
   0xc   : > { %s543_s25 = scalar_select %p105_p7, %s454_s14, %s107_s21  }
   0xd   : > { %p159_p10 = pnand %p322_p6, %p158_p9 }
   0xe   : > { %v215_v0 = vld [vmem:[%s612_s1] sm:$0xf] (!%p159_p10)  ;;  %v468_v1 = vmov (!%p159_p10), 0   ;;  %p184_p11 = scmp.lt.s32.totalorder (!%p159_p10), %s458_s15, 1  ;;  %vm192_vm0 = vcmask (!%p159_p10), 125952   ;;  %s181_s8 = sand.u32 (!%p159_p10), 1, %s450_s13  }
   0xf   : > { %162 = sbr.rel (%p159_p10) target bundleno = 164 (0xa4), region = 32  ;;  %385 = vset.pattern.permute.xlu0 (!%p159_p10), %v468_v1  ;;  %v216_v2 = vld [vmem:[%s613_s2] sm:$0xf] (!%p159_p10)  ;;  %s323_s9 = sshll.u32 (!%p159_p10), %s181_s8, 2 }
  0x10   : > { %221 = vperm.xlu0 (!%p159_p10), %385, %v215_v0   ;;  %s326_s10 = sshll.u32 (!%p159_p10), %s458_s15, 6  ;;  %s183_s11 = scalar_lea.vmem (!%p159_p10), [#allocation2], %s323_s9 }
  0x11   : > { %s247_s18 = sshll.u32 (!%p159_p10), %s183_s11, 4  ;;  %s563_s23 = scalar_lea.hbm (!%p159_p10), %s614_s3, %s326_s10  ;;  %s565_s18 = int_to_ptr.vmem [resolvable:$true] %s247_s18 }
  0x12   : > { %s233_s26 = scalar_lea.sflag (!%p159_p10), [#allocation3], %s181_s8  ;;  %s388_s27 = scalar_lea.vmem (!%p159_p10), %s565_s18, 64 }
  0x13   : > { %p389_p12 = scmp.ne.s32.totalorder (!%p159_p10), %s565_s18, %s388_s27 }
  0x14   : > { %227 = vperm.xlu0 (!%p159_p10), %385, %v216_v2  }
  0x15   : > { %p390_p13 = pnand (!%p159_p10), %p389_p12, %p530_p4 }
  0x16   : > { %s185_s30 = scalar_select %p184_p11, %s458_s15, 1 }
  0x17   : > { %p391_p0 = pneg %p390_p13  ;;  %s469_s15 = smov [#allocation2]  }
  0x18   : > { %s324_s4 = sshll.u32 %s185_s30, 2  ;;  %s392_s28 = sshll.u32 %s469_s15, 4  ;;  %s393_s28 = int_to_ptr.vmem [resolvable:$false] %s392_s28 }
  0x19   : > { %s190_s7 = scalar_lea.vmem %s611_s0, %s324_s4  ;;  %s394_s29 = scalar_lea.vmem %s393_s28, 128 }
  0x1a   : > { %v191_v3 = vld [vmem:[%s190_s7] sm:$0xf]  ;;  %p395_p1 = scmp.lt.s32.totalorder %s565_s18, %s393_s28  ;;  %p396_p2 = scmp.lt.s32.totalorder %s394_s29, %s388_s27 }
  0x1b   : > { %v193_v4 = vsel %vm192_vm0, %v191_v3, 0.0  ;;  %v200_v5 = vmul.f32 %v191_v3, %v191_v3 }
  0x1c   : > { %v194_v6 = vrot.slane %v193_v4, 4  ;;  %p397_p3 = por %p396_p2, %p395_p1 }
  0x1d   : > { %v201_v7 = vsel %vm192_vm0, %v200_v5, 0.0 }
  0x1e   : > { %v195_v8 = vadd.f32 %v194_v6, %v193_v4  ;;  %v202_v9 = vrot.slane %v201_v7, 4  ;;  %p398_p5 = pnand %p397_p3, %p391_p0 }
  0x20   : > { %v196_v10 = vrot.slane %v195_v8, 2  ;;  %v203_v11 = vadd.f32 %v202_v9, %v201_v7 }
  0x22   : > { %v197_v12 = vadd.f32 %v196_v10, %v195_v8  ;;  %v204_v13 = vrot.slane %v203_v11, 2 }
  0x24   : > { %v198_v14 = vrot.slane %v197_v12, 1  ;;  %v205_v15 = vadd.f32 %v204_v13, %v203_v11 }
  0x26   : > { %v199_v16 = vadd.f32 %v198_v14, %v197_v12  ;;  %v206_v17 = vrot.slane %v205_v15, 1 }
  0x28   : > { %v207_v18 = vadd.f32 %v206_v17, %v205_v15  ;;  %v208_v19 = vmul.f32 0.25, %v199_v16 }
  0x2a   : > { %v209_v20 = vmul.f32 0.25, %v207_v18  ;;  %v210_v21 = vmul.f32 %v208_v19, %v208_v19  ;;  %v217_v25 = vsub.f32 %v191_v3, %v208_v19 }
  0x2c   : > { %v211_v22 = vsub.f32 %v209_v20, %v210_v21 }
  0x2e   : > { %v212_v23 = vmax.f32 %v211_v22, 0.0 }
  0x30   : > { %v213_v24 = vadd.f32 0.0001, %v212_v23 }
  0x32   : > { %386 = vrsqrt.f32 %v213_v24 }
  0x3c   : > { %v387_v26 = vpop.eup %386 }
  0x3d   : > { %v218_v27 = vmul.f32 %v387_v26, %v217_v25 }
  0x8f   : > { %v222_v28 = vpop.permute.xlu0 %221 }
  0x90   : > { %v224_v29 = vmul.f32 %v222_v28, %v218_v27 }
  0x93   : > { %v228_v30 = vpop.permute.xlu0 %227 }
  0x94   : > { %v230_v31 = vadd.f32 %v228_v30, %v224_v29 }
  0x96   : > { %231 = vst.msk [vmem:[%s183_s11] sm:$0xf] %vm192_vm0, %v230_v31 }
  0x97   : > { %401 = shalt.err (!%p398_p5)
}
  0x98   : > { %s402_s30 = scalar_lea.hbm %s563_s23, 64  ;;  %s406_s6 = scalar_lea.hbm %s614_s3, 128 }
  0x99   : > { %p403_p6 = scmp.ne.s32.totalorder %s563_s23, %s402_s30  ;;  %p407_p10 = scmp.lt.u32.totalorder %s563_s23, %s614_s3 }
  0x9a   : > { %p408_p11 = scmp.lt.u32.totalorder %s406_s6, %s402_s30  ;;  %p410_p13 = scmp.lt.u32.totalorder %s402_s30, %s563_s23 }
  0x9b   : > { %p404_p7 = pnand %p403_p6, %p530_p4 }
  0x9c   : > { %p409_p12 = por %p408_p11, %p407_p10 }
  0x9d   : > { %p405_p9 = pneg %p404_p7 }
  0x9e   : > { %p411_p0 = por %p410_p13, %p409_p12 }
  0xa0   : > { %p412_p1 = pnand %p411_p0, %p405_p9 }
  0xa2   : > { %415 = shalt.err (!%p412_p1)
}
  0xa3   : > { %329 = dma.vmem_to_hbm [thread:$0]  (%p530_p4), %s565_s18, 64, %s563_s23, %s233_s26  }
  0xa4 PF: > { %p335_p2 = scmp.ge.s32.totalorder %s466_s17, 2  ;;  %s259_s9 = sand.u32 1, %s446_s12  }
  0xa5   : > { %s260_s10 = scalar_lea.sflag [#allocation3], %s259_s9 }
  0xa6   : > { %p332_p3 = pnand %p335_p2, %p537_p8 }
  0xa8   : > { %441 = dma.done.wait (!%p332_p3), %s260_s10, 64  }
  0xa9   : > { %443 = vsyncadd (!%p332_p3), %s260_s10, 4294967232  ;;  %s16_s17 = sadd.s32 1, %s466_s17   ;;  %s617_s12 = smov %s450_s13 }
  0xaa   : > { %p13_p5 = scmp.ge.s32.totalorder %s16_s17, 4   ;;  %s618_s13 = smov %s454_s14 }
  0xab   : > { %s619_s14 = smov %s543_s25  ;;  %s620_s15 = smov %s462_s16 }
  0xac   : > { %s621_s16 = smov %s623_s20  ;;  %15 = sbr.rel (!%p13_p5) target bundleno = 4 (0x4), region = 67 }
  0xb3   :  { %265 = vsyncpa [#allocation3], 1 }
  0xb4   :  { %267 = vsyncpa [#allocation3 + $0x1], 1 }

</bundles_post_ra>
